<compile_context>
chip_gen: v7x
topology: tpu7x:2x2x1
jax: 0.10.0
libtpu: 0.0.40
codegen_flags: <defaults>
</compile_context>

<pallas_src>
import jax
import jax.numpy as jnp
from jax.experimental import pallas as pl
from jax.experimental.pallas import tpu as pltpu


def _round_up(x, m):
    return ((x + m - 1) // m) * m


# ----------------------------- Pallas kernel ------------------------------ #
def ncf_kernel(gmf_u_ref, gmf_i_ref, mlp_x_ref,
               w1_ref, b1_ref, w2_ref, b2_ref, w3_ref, b3_ref,
               wg_ref, wm_ref, bf_ref, out_ref):
    """Feature-major layout: every activation is (features, TILE_B)."""
    f32 = jnp.float32
    cdt = w2_ref.dtype  # MXU operand dtype (bf16)

    # ---- MLP tower: y = W @ x (+ b), ReLU.  Dropout = identity (eval). ----
    h = jnp.dot(w1_ref[...], mlp_x_ref[...], preferred_element_type=f32)
    h = jnp.maximum(h + b1_ref[...], 0.0)                      # (h1, T) f32
    h = jnp.dot(w2_ref[...], h.astype(cdt), preferred_element_type=f32)
    h = jnp.maximum(h + b2_ref[...], 0.0)                      # (h2, T) f32
    h = jnp.dot(w3_ref[...], h.astype(cdt), preferred_element_type=f32)
    h = jnp.maximum(h + b3_ref[...], 0.0)                      # (h3, T) f32

    # ---- GMF tower: elementwise product, kept in f32 (VPU-native on v5e) --
    gmf = gmf_u_ref[...].astype(f32) * gmf_i_ref[...].astype(f32)  # (D, T)

    # ---- Final projection: VPU multiply + sublane reduce -> (1, T) row ----
    logit = (jnp.sum(gmf * wg_ref[...].astype(f32), axis=0, keepdims=True)
             + jnp.sum(h * wm_ref[...].astype(f32), axis=0, keepdims=True)
             + bf_ref[...])                                    # (1, T) lane-dense

    out_ref[...] = jax.nn.sigmoid(logit)


def ncf_forward_pallas(gmf_u_t, gmf_i_t, mlp_x_t, params, tile_b):
    """gmf_*_t: (D, B_pad), mlp_x_t: (2D, B_pad); B_pad % tile_b == 0."""
    D, B_pad = gmf_u_t.shape
    assert B_pad % tile_b == 0 and tile_b % 128 == 0
    grid = (B_pad // tile_b,)

    w1, b1 = params["w1"], params["b1"]
    w2, b2 = params["w2"], params["b2"]
    w3, b3 = params["w3"], params["b3"]
    wg, wm, bf = params["wf_gmf"], params["wf_mlp"], params["bf"]

    def batch_spec(feat):
        # Tile along the batch (lane) axis; new block every grid step.
        return pl.BlockSpec((feat, tile_b), lambda i: (0, i))

    def resident_spec(arr):
        # Full array as one block, same block index every step -> stays in VMEM.
        return pl.BlockSpec(arr.shape, lambda i: (0,) * arr.ndim)

    in_specs = [
        batch_spec(D), batch_spec(D), batch_spec(2 * D),
        resident_spec(w1), resident_spec(b1),
        resident_spec(w2), resident_spec(b2),
        resident_spec(w3), resident_spec(b3),
        resident_spec(wg), resident_spec(wm), resident_spec(bf),
    ]

    out = pl.pallas_call(
        ncf_kernel,
        out_shape=jax.ShapeDtypeStruct((1, B_pad), jnp.float32),
        grid=grid,
        in_specs=in_specs,
        out_specs=pl.BlockSpec((1, tile_b), lambda i: (0, i)),
        compiler_params=pltpu.CompilerParams(
            dimension_semantics=("parallel",)),
    )(gmf_u_t, gmf_i_t, mlp_x_t, w1, b1, w2, b2, w3, b3, wg, wm, bf)
    return out  # (1, B_pad)


# ------------------------------ model wrapper ------------------------------ #
def ncf_model(user_indices, item_indices, params, tile_b=1024):
    """Returns sigmoid scores, shape (batch,). Matches NCFModel.forward (eval)."""
    B = user_indices.shape[0]
    D = params["gmf_user_emb"].shape[1]

    # Pick a batch tile: large enough to amortize per-step overhead, clamped
    # for small batches; lane axis requires multiples of 128.
    tile_b = min(tile_b, _round_up(max(B, 1), 128))
    B_pad = _round_up(B, tile_b)

    u = jnp.pad(user_indices, (0, B_pad - B))
    it = jnp.pad(item_indices, (0, B_pad - B))

    # Embedding gathers (glue, plain JAX) + transpose to feature-major layout
    # (features on sublanes, batch on lanes) so the kernel output is lane-dense.
    gmf_u_t = jnp.take(params["gmf_user_emb"], u, axis=0).T        # (D, B_pad)
    gmf_i_t = jnp.take(params["gmf_item_emb"], it, axis=0).T       # (D, B_pad)
    mlp_x_t = jnp.concatenate(
        [jnp.take(params["user_emb"], u, axis=0),
         jnp.take(params["item_emb"], it, axis=0)], axis=-1).T     # (2D, B_pad)

    out = ncf_forward_pallas(gmf_u_t, gmf_i_t, mlp_x_t, params, tile_b)
    return out[0, :B]


# ------------------------- deterministic parameters ------------------------ #
def xavier_uniform(key, fan_out, fan_in):
    """PyTorch nn.Linear layout: (out_features, in_features)."""
    bound = (6.0 / (fan_in + fan_out)) ** 0.5
    return jax.random.uniform(key, (fan_out, fan_in), jnp.float32, -bound, bound)


def init_ncf_params(key, num_users, num_items, embedding_dim, hidden_layers):
    assert len(hidden_layers) == 3, "kernel is specialized to 3 hidden layers"
    D = embedding_dim
    h1, h2, h3 = hidden_layers
    ks = jax.random.split(key, 8)
    bf16 = jnp.bfloat16
    p = {}
    # Embedding tables ~ N(0, 0.01), stored bf16 (halves gather HBM traffic).
    p["user_emb"]     = (0.01 * jax.random.normal(ks[0], (num_users, D), jnp.float32)).astype(bf16)
    p["item_emb"]     = (0.01 * jax.random.normal(ks[1], (num_items, D), jnp.float32)).astype(bf16)
    p["gmf_user_emb"] = (0.01 * jax.random.normal(ks[2], (num_users, D), jnp.float32)).astype(bf16)
    p["gmf_item_emb"] = (0.01 * jax.random.normal(ks[3], (num_items, D), jnp.float32)).astype(bf16)
    # MLP linears, PyTorch (out, in) layout, bf16 weights / f32 biases.
    p["w1"] = xavier_uniform(ks[4], h1, 2 * D).astype(bf16)
    p["b1"] = jnp.zeros((h1, 1), jnp.float32)
    p["w2"] = xavier_uniform(ks[5], h2, h1).astype(bf16)
    p["b2"] = jnp.zeros((h2, 1), jnp.float32)
    p["w3"] = xavier_uniform(ks[6], h3, h2).astype(bf16)
    p["b3"] = jnp.zeros((h3, 1), jnp.float32)
    # Final Linear(D + h3 -> 1), split into GMF / MLP column vectors.
    wf = xavier_uniform(ks[7], 1, D + h3)                      # (1, D + h3)
    p["wf_gmf"] = wf[:, :D].T.astype(bf16)                     # (D, 1)
    p["wf_mlp"] = wf[:, D:].T.astype(bf16)                     # (h3, 1)
    p["bf"] = jnp.zeros((1, 1), jnp.float32)
    return p


# -------------------------------- reference -------------------------------- #
def ncf_model_ref(user_indices, item_indices, p):
    f32 = jnp.float32
    bf16 = jnp.bfloat16
    gmf = (jnp.take(p["gmf_user_emb"], user_indices, 0).astype(f32)
           * jnp.take(p["gmf_item_emb"], item_indices, 0).astype(f32))
    x = jnp.concatenate([jnp.take(p["user_emb"], user_indices, 0),
                         jnp.take(p["item_emb"], item_indices, 0)], axis=-1)
    h = jnp.maximum(jnp.dot(x, p["w1"].T, preferred_element_type=f32) + p["b1"][:, 0], 0.0)
    h = jnp.maximum(jnp.dot(h.astype(bf16), p["w2"].T, preferred_element_type=f32) + p["b2"][:, 0], 0.0)
    h = jnp.maximum(jnp.dot(h.astype(bf16), p["w3"].T, preferred_element_type=f32) + p["b3"][:, 0], 0.0)
    logit = (gmf @ p["wf_gmf"].astype(f32)
             + h @ p["wf_mlp"].astype(f32)
             + p["bf"])
    return jax.nn.sigmoid(logit)[:, 0]


if __name__ == "__main__":
    num_users, num_items = 50, 40
    embedding_dim = 64
    hidden_layers = [128, 64, 32]
    batch = 8

    key = jax.random.PRNGKey(0)
    k_params, k_u, k_i = jax.random.split(key, 3)
    params = init_ncf_params(k_params, num_users, num_items, embedding_dim, hidden_layers)

    user_indices = jax.random.randint(k_u, (batch,), 0, num_users, dtype=jnp.int32)
    item_indices = jax.random.randint(k_i, (batch,), 0, num_items, dtype=jnp.int32)

    out = ncf_model(user_indices, item_indices, params)
    out = jax.block_until_ready(out)

    ref = ncf_model_ref(user_indices, item_indices, params)
    assert out.shape == (batch,)
    assert jnp.allclose(out, ref, atol=2e-3, rtol=2e-3), (out, ref)

    print("KERNEL_OK")
</pallas_src>

<mosaic_0001>
module attributes {stable_mosaic.version = 11 : i64} {
  func.func @ncf_kernel(%arg0: i32, %arg1: memref<64x128xbf16, #tpu.memory_space<vmem>>, %arg2: memref<64x128xbf16, #tpu.memory_space<vmem>>, %arg3: memref<128x128xbf16, #tpu.memory_space<vmem>>, %arg4: memref<128x128xbf16, #tpu.memory_space<vmem>>, %arg5: memref<128x1xf32, #tpu.memory_space<vmem>>, %arg6: memref<64x128xbf16, #tpu.memory_space<vmem>>, %arg7: memref<64x1xf32, #tpu.memory_space<vmem>>, %arg8: memref<32x64xbf16, #tpu.memory_space<vmem>>, %arg9: memref<32x1xf32, #tpu.memory_space<vmem>>, %arg10: memref<64x1xbf16, #tpu.memory_space<vmem>>, %arg11: memref<32x1xbf16, #tpu.memory_space<vmem>>, %arg12: memref<1x1xf32, #tpu.memory_space<vmem>>, %arg13: memref<1x128xf32, #tpu.memory_space<vmem>>) attributes {dimension_semantics = [#tpu.dimension_semantics<parallel>], iteration_bounds = array<i64: 1>, scalar_prefetch = 0 : i64, scratch_operands = 0 : i64, tpu.core_type = #tpu.core_type<tc>, window_params = [{transform_indices = @transform_0, window_bounds = array<i64: 64, 128>}, {transform_indices = @transform_1, window_bounds = array<i64: 64, 128>}, {transform_indices = @transform_2, window_bounds = array<i64: 128, 128>}, {pipeline_mode = #tpu.pipeline_mode<synchronous>, transform_indices = @transform_3, window_bounds = array<i64: 128, 128>}, {pipeline_mode = #tpu.pipeline_mode<synchronous>, transform_indices = @transform_4, window_bounds = array<i64: 128, 1>}, {pipeline_mode = #tpu.pipeline_mode<synchronous>, transform_indices = @transform_5, window_bounds = array<i64: 64, 128>}, {pipeline_mode = #tpu.pipeline_mode<synchronous>, transform_indices = @transform_6, window_bounds = array<i64: 64, 1>}, {pipeline_mode = #tpu.pipeline_mode<synchronous>, transform_indices = @transform_7, window_bounds = array<i64: 32, 64>}, {pipeline_mode = #tpu.pipeline_mode<synchronous>, transform_indices = @transform_8, window_bounds = array<i64: 32, 1>}, {pipeline_mode = #tpu.pipeline_mode<synchronous>, transform_indices = @transform_9, window_bounds = array<i64: 64, 1>}, {pipeline_mode = #tpu.pipeline_mode<synchronous>, transform_indices = @transform_10, window_bounds = array<i64: 32, 1>}, {pipeline_mode = #tpu.pipeline_mode<synchronous>, transform_indices = @transform_11, window_bounds = array<i64: 1, 1>}, {transform_indices = @transform_12, window_bounds = array<i64: 1, 128>}]} {
    %c0 = arith.constant 0 : index
    %c0_0 = arith.constant 0 : index
    %0 = vector.load %arg4[%c0, %c0_0] : memref<128x128xbf16, #tpu.memory_space<vmem>>, vector<128x128xbf16>
    %c0_1 = arith.constant 0 : index
    %c0_2 = arith.constant 0 : index
    %1 = vector.load %arg3[%c0_1, %c0_2] : memref<128x128xbf16, #tpu.memory_space<vmem>>, vector<128x128xbf16>
    %cst = arith.constant dense<0.000000e+00> : vector<128x128xf32>
    %2 = tpu.matmul %0, %1, %cst {dimension_numbers = #tpu.dot_dimension_numbers<[1], [0], [0], [1], [0, 0, 1, 1], [], []>} : vector<128x128xbf16>, vector<128x128xbf16>, vector<128x128xf32> -> vector<128x128xf32>
    %c0_3 = arith.constant 0 : index
    %c0_4 = arith.constant 0 : index
    %3 = vector.load %arg5[%c0_3, %c0_4] : memref<128x1xf32, #tpu.memory_space<vmem>>, vector<128x1xf32>
    %4 = vector.broadcast %3 : vector<128x1xf32> to vector<128x128xf32>
    %5 = arith.addf %2, %4 : vector<128x128xf32>
    %cst_5 = arith.constant 0.000000e+00 : f32
    %6 = vector.broadcast %cst_5 : f32 to vector<128x128xf32>
    %7 = arith.maximumf %5, %6 : vector<128x128xf32>
    %c0_6 = arith.constant 0 : index
    %c0_7 = arith.constant 0 : index
    %8 = vector.load %arg6[%c0_6, %c0_7] : memref<64x128xbf16, #tpu.memory_space<vmem>>, vector<64x128xbf16>
    %9 = arith.truncf %7 : vector<128x128xf32> to vector<128x128xbf16>
    %cst_8 = arith.constant dense<0.000000e+00> : vector<64x128xf32>
    %10 = tpu.matmul %8, %9, %cst_8 {dimension_numbers = #tpu.dot_dimension_numbers<[1], [0], [0], [1], [0, 0, 1, 1], [], []>} : vector<64x128xbf16>, vector<128x128xbf16>, vector<64x128xf32> -> vector<64x128xf32>
    %c0_9 = arith.constant 0 : index
    %c0_10 = arith.constant 0 : index
    %11 = vector.load %arg7[%c0_9, %c0_10] : memref<64x1xf32, #tpu.memory_space<vmem>>, vector<64x1xf32>
    %12 = vector.broadcast %11 : vector<64x1xf32> to vector<64x128xf32>
    %13 = arith.addf %10, %12 : vector<64x128xf32>
    %cst_11 = arith.constant 0.000000e+00 : f32
    %14 = vector.broadcast %cst_11 : f32 to vector<64x128xf32>
    %15 = arith.maximumf %13, %14 : vector<64x128xf32>
    %c0_12 = arith.constant 0 : index
    %c0_13 = arith.constant 0 : index
    %16 = vector.load %arg8[%c0_12, %c0_13] : memref<32x64xbf16, #tpu.memory_space<vmem>>, vector<32x64xbf16>
    %17 = arith.truncf %15 : vector<64x128xf32> to vector<64x128xbf16>
    %cst_14 = arith.constant dense<0.000000e+00> : vector<32x128xf32>
    %18 = tpu.matmul %16, %17, %cst_14 {dimension_numbers = #tpu.dot_dimension_numbers<[1], [0], [0], [1], [0, 0, 1, 1], [], []>} : vector<32x64xbf16>, vector<64x128xbf16>, vector<32x128xf32> -> vector<32x128xf32>
    %c0_15 = arith.constant 0 : index
    %c0_16 = arith.constant 0 : index
    %19 = vector.load %arg9[%c0_15, %c0_16] : memref<32x1xf32, #tpu.memory_space<vmem>>, vector<32x1xf32>
    %20 = vector.broadcast %19 : vector<32x1xf32> to vector<32x128xf32>
    %21 = arith.addf %18, %20 : vector<32x128xf32>
    %cst_17 = arith.constant 0.000000e+00 : f32
    %22 = vector.broadcast %cst_17 : f32 to vector<32x128xf32>
    %23 = arith.maximumf %21, %22 : vector<32x128xf32>
    %c0_18 = arith.constant 0 : index
    %c0_19 = arith.constant 0 : index
    %24 = vector.load %arg1[%c0_18, %c0_19] : memref<64x128xbf16, #tpu.memory_space<vmem>>, vector<64x128xbf16>
    %25 = arith.extf %24 : vector<64x128xbf16> to vector<64x128xf32>
    %c0_20 = arith.constant 0 : index
    %c0_21 = arith.constant 0 : index
    %26 = vector.load %arg2[%c0_20, %c0_21] : memref<64x128xbf16, #tpu.memory_space<vmem>>, vector<64x128xbf16>
    %27 = arith.extf %26 : vector<64x128xbf16> to vector<64x128xf32>
    %28 = arith.mulf %25, %27 : vector<64x128xf32>
    %c0_22 = arith.constant 0 : index
    %c0_23 = arith.constant 0 : index
    %29 = vector.load %arg10[%c0_22, %c0_23] : memref<64x1xbf16, #tpu.memory_space<vmem>>, vector<64x1xbf16>
    %30 = arith.extf %29 : vector<64x1xbf16> to vector<64x1xf32>
    %31 = vector.broadcast %30 : vector<64x1xf32> to vector<64x128xf32>
    %32 = arith.mulf %28, %31 : vector<64x128xf32>
    %cst_24 = arith.constant dense<0.000000e+00> : vector<128xf32>
    %33 = vector.multi_reduction <add>, %32, %cst_24 [0] : vector<64x128xf32> to vector<128xf32>
    %34 = vector.shape_cast %33 : vector<128xf32> to vector<1x128xf32>
    %c0_25 = arith.constant 0 : index
    %c0_26 = arith.constant 0 : index
    %35 = vector.load %arg11[%c0_25, %c0_26] : memref<32x1xbf16, #tpu.memory_space<vmem>>, vector<32x1xbf16>
    %36 = arith.extf %35 : vector<32x1xbf16> to vector<32x1xf32>
    %37 = vector.broadcast %36 : vector<32x1xf32> to vector<32x128xf32>
    %38 = arith.mulf %23, %37 : vector<32x128xf32>
    %cst_27 = arith.constant dense<0.000000e+00> : vector<128xf32>
    %39 = vector.multi_reduction <add>, %38, %cst_27 [0] : vector<32x128xf32> to vector<128xf32>
    %40 = vector.shape_cast %39 : vector<128xf32> to vector<1x128xf32>
    %41 = arith.addf %34, %40 : vector<1x128xf32>
    %c0_28 = arith.constant 0 : index
    %c0_29 = arith.constant 0 : index
    %42 = vector.load %arg12[%c0_28, %c0_29] : memref<1x1xf32, #tpu.memory_space<vmem>>, vector<1x1xf32>
    %43 = vector.broadcast %42 : vector<1x1xf32> to vector<1x128xf32>
    %44 = arith.addf %41, %43 : vector<1x128xf32>
    %45 = arith.negf %44 : vector<1x128xf32>
    %46 = math.exp %45 : vector<1x128xf32>
    %cst_30 = arith.constant 1.000000e+00 : f32
    %47 = vector.broadcast %cst_30 : f32 to vector<1x128xf32>
    %48 = arith.addf %47, %46 : vector<1x128xf32>
    %49 = arith.divf %47, %48 : vector<1x128xf32>
    %c0_31 = arith.constant 0 : index
    %c0_32 = arith.constant 0 : index
    %50 = vector.load %arg13[%c0_31, %c0_32] : memref<1x128xf32, #tpu.memory_space<vmem>>, vector<1x128xf32>
    tpu.vector_store %arg13[%c0_31, %c0_32], %49 {strides = array<i32>} : memref<1x128xf32, #tpu.memory_space<vmem>>, vector<1x128xf32>,
    return
  }
  func.func @transform_0(%arg0: i32) -> (i32, i32) {
    %c0_i32 = arith.constant 0 : i32
    %c0_i32_0 = arith.constant 0 : i32
    return %c0_i32, %arg0 : i32, i32
  }
  func.func @transform_1(%arg0: i32) -> (i32, i32) {
    %c0_i32 = arith.constant 0 : i32
    %c0_i32_0 = arith.constant 0 : i32
    return %c0_i32, %arg0 : i32, i32
  }
  func.func @transform_2(%arg0: i32) -> (i32, i32) {
    %c0_i32 = arith.constant 0 : i32
    %c0_i32_0 = arith.constant 0 : i32
    return %c0_i32, %arg0 : i32, i32
  }
  func.func @transform_3(%arg0: i32) -> (i32, i32) {
    %c0_i32 = arith.constant 0 : i32
    %c0_i32_0 = arith.constant 0 : i32
    %c0_i32_1 = arith.constant 0 : i32
    return %c0_i32, %c0_i32_0 : i32, i32
  }
  func.func @transform_4(%arg0: i32) -> (i32, i32) {
    %c0_i32 = arith.constant 0 : i32
    %c0_i32_0 = arith.constant 0 : i32
    %c0_i32_1 = arith.constant 0 : i32
    return %c0_i32, %c0_i32_0 : i32, i32
  }
  func.func @transform_5(%arg0: i32) -> (i32, i32) {
    %c0_i32 = arith.constant 0 : i32
    %c0_i32_0 = arith.constant 0 : i32
    %c0_i32_1 = arith.constant 0 : i32
    return %c0_i32, %c0_i32_0 : i32, i32
  }
  func.func @transform_6(%arg0: i32) -> (i32, i32) {
    %c0_i32 = arith.constant 0 : i32
    %c0_i32_0 = arith.constant 0 : i32
    %c0_i32_1 = arith.constant 0 : i32
    return %c0_i32, %c0_i32_0 : i32, i32
  }
  func.func @transform_7(%arg0: i32) -> (i32, i32) {
    %c0_i32 = arith.constant 0 : i32
    %c0_i32_0 = arith.constant 0 : i32
    %c0_i32_1 = arith.constant 0 : i32
    return %c0_i32, %c0_i32_0 : i32, i32
  }
  func.func @transform_8(%arg0: i32) -> (i32, i32) {
    %c0_i32 = arith.constant 0 : i32
    %c0_i32_0 = arith.constant 0 : i32
    %c0_i32_1 = arith.constant 0 : i32
    return %c0_i32, %c0_i32_0 : i32, i32
  }
  func.func @transform_9(%arg0: i32) -> (i32, i32) {
    %c0_i32 = arith.constant 0 : i32
    %c0_i32_0 = arith.constant 0 : i32
    %c0_i32_1 = arith.constant 0 : i32
    return %c0_i32, %c0_i32_0 : i32, i32
  }
  func.func @transform_10(%arg0: i32) -> (i32, i32) {
    %c0_i32 = arith.constant 0 : i32
    %c0_i32_0 = arith.constant 0 : i32
    %c0_i32_1 = arith.constant 0 : i32
    return %c0_i32, %c0_i32_0 : i32, i32
  }
  func.func @transform_11(%arg0: i32) -> (i32, i32) {
    %c0_i32 = arith.constant 0 : i32
    %c0_i32_0 = arith.constant 0 : i32
    %c0_i32_1 = arith.constant 0 : i32
    return %c0_i32, %c0_i32_0 : i32, i32
  }
  func.func @transform_12(%arg0: i32) -> (i32, i32) {
    %c0_i32 = arith.constant 0 : i32
    %c0_i32_0 = arith.constant 0 : i32
    return %c0_i32, %arg0 : i32, i32
  }
}

</mosaic_0001>

<bundles_post_ra>
// kernel: tpu_custom_call.1
= control target key start
LH: loop header
LB: loop body
LE: loop exit
PB: predicated region body
PF: predicated region fallthrough
CT: control target
= control target key end

     0   :  { %s1389_s0 = inlined_call_operand.vmem [shape: bf16[64,128], index: 0, kind: input, shape index: {}]   ;;  %s1390_s1 = inlined_call_operand.vmem [shape: bf16[64,128], index: 1, kind: input, shape index: {}]   ;;  %s1391_s2 = inlined_call_operand.vmem [shape: bf16[128,128], index: 2, kind: input, shape index: {}]   ;;  %s1392_s3 = inlined_call_operand.vmem [shape: bf16[128,128], index: 3, kind: input, shape index: {}]   ;;  %s1393_s4 = inlined_call_operand.vmem [shape: f32[128,1], index: 4, kind: input, shape index: {}]   ;;  %s1394_s5 = inlined_call_operand.vmem [shape: bf16[64,128], index: 5, kind: input, shape index: {}]   ;;  %s1395_s6 = inlined_call_operand.vmem [shape: f32[64,1], index: 6, kind: input, shape index: {}]   ;;  %s1396_s7 = inlined_call_operand.vmem [shape: bf16[32,64], index: 7, kind: input, shape index: {}]   ;;  %s1397_s8 = inlined_call_operand.vmem [shape: f32[32,1], index: 8, kind: input, shape index: {}]   ;;  %s1398_s9 = inlined_call_operand.vmem [shape: bf16[64,1], index: 9, kind: input, shape index: {}]   ;;  %s1399_s10 = inlined_call_operand.vmem [shape: bf16[32,1], index: 10, kind: input, shape index: {}]   ;;  %s1400_s11 = inlined_call_operand.<no memory space> [shape: f32[1,1], index: 11, kind: input, shape index: {}]   ;;  %s1401_s12 = inlined_call_operand.hbm [shape: f32[1,128], index: 12, kind: output, shape index: {}]  }
   0x1   :  { %v17_v0 = vstv %s1400_s11 }
   0x2   :  { %18 = vst [vmem:[#allocation2] sm:$0x1] %v17_v0 }
   0x3   :  { %v1063_v1 = vld [vmem:[%s1391_s2] sm:$0xff]   ;;  %v1064_v2 = vld [vmem:[%s1391_s2 + $0x8] sm:$0xff]   ;;  %v1113_v3 = vmov 0   ;;  %v1065_v4 = vld [vmem:[%s1391_s2 + $0x10] sm:$0xff]  }
   0x4   :  { %1031 = vset.pattern.permute.xlu0 %v1113_v3  ;;  %1032 = vset.pattern.permute.xlu1 %v1113_v3  ;;  %v1066_v5 = vld [vmem:[%s1391_s2 + $0x18] sm:$0xff]   ;;  %v1071_v6 = vld [vmem:[%s1392_s3] sm:$0xff]   ;;  %v79_v9 = vld [vmem:[%s1393_s4 + $0x10] sm:$0xff] }
   0x5   :  { %961 = vmatprep.subr.bf16.mxu0 %v1063_v1  ;;  %977 = vmatprep.mubr.bf16.mxu0 %v1071_v6  ;;  %v1067_v7 = vld [vmem:[%s1391_s2 + $0x20] sm:$0xff]   ;;  %v78_v10 = vld [vmem:[%s1393_s4 + $0x8] sm:$0xff]  ;;  %v80_v11 = vld [vmem:[%s1393_s4 + $0x18] sm:$0xff] }
   0x6   :  { %962 = vmatpush3.bf16.msra.mxu0 %v1063_v1  ;;  %v77_v8 = vld [vmem:[%s1393_s4] sm:$0xff]  ;;  %105 = vperm.xlu1 %1032, %v79_v9   ;;  %v1068_v12 = vld [vmem:[%s1391_s2 + $0x28] sm:$0xff]   ;;  %v1069_v15 = vld [vmem:[%s1391_s2 + $0x30] sm:$0xff]  }
   0x7   :  { %963 = vmatprep.subr.bf16.mxu0 %v1064_v2  ;;  %95 = vperm.xlu0 %1031, %v77_v8   ;;  %v81_v13 = vld [vmem:[%s1393_s4 + $0x20] sm:$0xff]  ;;  %v82_v14 = vld [vmem:[%s1393_s4 + $0x28] sm:$0xff]  ;;  %v83_v16 = vld [vmem:[%s1393_s4 + $0x30] sm:$0xff] }
   0x8   :  { %v84_v17 = vld [vmem:[%s1393_s4 + $0x38] sm:$0xff]  ;;  %v85_v19 = vld [vmem:[%s1393_s4 + $0x40] sm:$0xff]  ;;  %v86_v20 = vld [vmem:[%s1393_s4 + $0x48] sm:$0xff] }
   0x9   :  { %v1070_v18 = vld [vmem:[%s1391_s2 + $0x38] sm:$0xff]   ;;  %v1072_v21 = vld [vmem:[%s1392_s3 + $0x8] sm:$0xff]   ;;  %v87_v22 = vld [vmem:[%s1393_s4 + $0x50] sm:$0xff] }
   0xa   :  { %964 = vmatpush3.bf16.msra.mxu0 %v1064_v2  ;;  %110 = vperm.xlu1 %1032, %v80_v11   ;;  %v88_v23 = vld [vmem:[%s1393_s4 + $0x58] sm:$0xff]  ;;  %v1073_v24 = vld [vmem:[%s1392_s3 + $0x10] sm:$0xff]  }
   0xb   :  { %965 = vmatprep.subr.bf16.mxu0 %v1065_v4  ;;  %100 = vperm.xlu0 %1031, %v78_v10  }
   0xe   :  { %966 = vmatpush3.bf16.msra.mxu0 %v1065_v4  ;;  %120 = vperm.xlu1 %1032, %v82_v14  }
   0xf   :  { %967 = vmatprep.subr.bf16.mxu0 %v1066_v5  ;;  %115 = vperm.xlu0 %1031, %v81_v13  }
  0x12   :  { %968 = vmatpush3.bf16.msra.mxu0 %v1066_v5  ;;  %130 = vperm.xlu1 %1032, %v84_v17  }
  0x13   :  { %969 = vmatprep.subr.bf16.mxu0 %v1067_v7  ;;  %125 = vperm.xlu0 %1031, %v83_v16  }
  0x16   :  { %970 = vmatpush3.bf16.msra.mxu0 %v1067_v7  ;;  %140 = vperm.xlu1 %1032, %v86_v20  }
  0x17   :  { %971 = vmatprep.subr.bf16.mxu0 %v1068_v12  ;;  %135 = vperm.xlu0 %1031, %v85_v19  }
  0x1a   :  { %972 = vmatpush3.bf16.msra.mxu0 %v1068_v12 }
  0x1b   :  { %973 = vmatprep.subr.bf16.mxu0 %v1069_v15 }
  0x1e   :  { %974 = vmatpush3.bf16.msra.mxu0 %v1069_v15 }
  0x1f   :  { %975 = vmatprep.subr.bf16.mxu0 %v1070_v18 }
  0x22   :  { %976 = vmatpush3.bf16.msra.mxu0 %v1070_v18 }
  0x23   :  { %19 = vsyncpa [#allocation4], 0  ;;  %145 = vperm.xlu0 %1031, %v87_v22   ;;  %150 = vperm.xlu1 %1032, %v88_v23   ;;  %v89_v25 = vld [vmem:[%s1393_s4 + $0x60] sm:$0xff]  ;;  %v90_v26 = vld [vmem:[%s1393_s4 + $0x68] sm:$0xff]  ;;  %vm585_vm0 = vcmask 523264  }
  0x24   :  { %v1074_v27 = vld [vmem:[%s1392_s3 + $0x18] sm:$0xff]   ;;  %v91_v28 = vld [vmem:[%s1393_s4 + $0x70] sm:$0xff]  ;;  %v1075_v30 = vld [vmem:[%s1392_s3 + $0x20] sm:$0xff]  }
  0x25   :  { %978 = vmatmul.mubr.bf16.vlgmr.msra.gmra.mrb[0].mxu0 %v1072_v21  ;;  %v92_v29 = vld [vmem:[%s1393_s4 + $0x78] sm:$0xff]  ;;  %v398_v31 = vld [vmem:[%s1395_s6] sm:$0xff]  ;;  %v399_v32 = vld [vmem:[%s1395_s6 + $0x8] sm:$0xff] }
  0x26   :  { %981 = vmatprep.mubr.bf16.mxu0 %v1073_v24  ;;  %v1076_v33 = vld [vmem:[%s1392_s3 + $0x28] sm:$0xff]   ;;  %v400_v34 = vld [vmem:[%s1395_s6 + $0x10] sm:$0xff]  ;;  %v401_v35 = vld [vmem:[%s1395_s6 + $0x18] sm:$0xff] }
  0x27   :  { %155 = vperm.xlu0 %1031, %v89_v25   ;;  %160 = vperm.xlu1 %1032, %v90_v26   ;;  %v1077_v36 = vld [vmem:[%s1392_s3 + $0x30] sm:$0xff]   ;;  %v402_v37 = vld [vmem:[%s1395_s6 + $0x20] sm:$0xff]  ;;  %v403_v38 = vld [vmem:[%s1395_s6 + $0x28] sm:$0xff] }
  0x28   :  { %v894_v39 = vld [vmem:[%s1398_s9] sm:$0xff]   ;;  %v923_v40 = vld [vmem:[%s1398_s9 + $0x8] sm:$0xff]   ;;  %v1078_v45 = vld [vmem:[%s1392_s3 + $0x38] sm:$0xff]  }
  0x29   :  { %v895_v41 = vunpack.c.l.bf16 %v894_v39  ;;  %v896_v42 = vunpack.c.h.bf16 %v894_v39  ;;  %v899_v43 = vunpack.c.l.bf16 %v923_v40  ;;  %v900_v44 = vunpack.c.h.bf16 %v923_v40  ;;  %v404_v46 = vld [vmem:[%s1395_s6 + $0x30] sm:$0xff]  ;;  %v405_v47 = vld [vmem:[%s1395_s6 + $0x38] sm:$0xff]  ;;  %v551_v53 = vld [vmem:[%s1397_s8] sm:$0xff] }
  0x2a   :  { %v924_v50 = vld [vmem:[%s1398_s9 + $0x10] sm:$0xff]   ;;  %v552_v54 = vld [vmem:[%s1397_s8 + $0x8] sm:$0xff]  ;;  %v910_v55 = vld [vmem:[%s1399_s10] sm:$0xff]  }
  0x2b   :  { %165 = vperm.xlu0 %1031, %v91_v28   ;;  %170 = vperm.xlu1 %1032, %v92_v29   ;;  %v1033_v48 = vpack.i.bf16 %v896_v42, %v895_v41  ;;  %v1038_v49 = vpack.i.bf16 %v900_v44, %v899_v43  ;;  %v903_v51 = vunpack.c.l.bf16 %v924_v50  ;;  %v904_v52 = vunpack.c.h.bf16 %v924_v50  ;;  %v925_v59 = vld [vmem:[%s1398_s9 + $0x18] sm:$0xff]   ;;  %v553_v60 = vld [vmem:[%s1397_s8 + $0x10] sm:$0xff]  ;;  %v926_v61 = vld [vmem:[%s1399_s10 + $0x8] sm:$0xff]  }
  0x2c   :  { %v911_v57 = vunpack.c.l.bf16 %v910_v55  ;;  %v912_v58 = vunpack.c.h.bf16 %v910_v55  ;;  %v907_v62 = vunpack.c.l.bf16 %v925_v59  ;;  %v915_v0 = vunpack.c.l.bf16 %v926_v61  ;;  %v554_v3 = vld [vmem:[%s1397_s8 + $0x18] sm:$0xff]  ;;  %v804_v6 = vld [vmem:[#allocation2] sm:$0x1] }
  0x2d   :  { %982 = vmatmul.mubr.bf16.gmra.mrb[4].mxu0 %v1074_v27  ;;  %v1043_v56 = vpack.i.bf16 %v904_v52, %v903_v51  ;;  %v908_v1 = vunpack.c.h.bf16 %v925_v59  ;;  %v916_v2 = vunpack.c.h.bf16 %v926_v61  ;;  %v1079_v7 = vld [vmem:[%s1394_s5] sm:$0xff]  }
  0x2e   :  { %985 = vmatprep.mubr.bf16.mxu0 %v1075_v30  ;;  %v1048_v63 = vpack.i.bf16 %v912_v58, %v911_v57  ;;  %v1053_v4 = vpack.i.bf16 %v915_v0, %v907_v62  ;;  %1009 = vmatprep.mubr.bf16.mxu1 %v1079_v7 }
  0x2f   :  { %408 = vperm.xlu0 %1031, %v398_v31   ;;  %413 = vperm.xlu1 %1032, %v399_v32   ;;  %v1058_v5 = vpack.i.bf16 %v916_v2, %v908_v1 }
  0x33   :  { %418 = vperm.xlu0 %1031, %v400_v34   ;;  %423 = vperm.xlu1 %1032, %v401_v35  }
  0x35   :  { %986 = vmatmul.mubr.bf16.gmra.mrb[8].mxu0 %v1076_v33 }
  0x36   :  { %989 = vmatprep.mubr.bf16.mxu0 %v1077_v36 }
  0x37   :  { %428 = vperm.xlu0 %1031, %v402_v37   ;;  %433 = vperm.xlu1 %1032, %v403_v38  }
  0x3b   :  { %438 = vperm.xlu0 %1031, %v404_v46   ;;  %443 = vperm.xlu1 %1032, %v405_v47  }
  0x3d   :  { %990 = vmatmul.mubr.bf16.gmra.mrb[12].mxu0 %v1078_v45 }
  0x3f   :  { %1034 = vperm.xlu0 %1031, %v1033_v48   ;;  %1039 = vperm.xlu1 %1032, %v1038_v49  }
  0x43   :  { %557 = vperm.xlu0 %1031, %v551_v53   ;;  %562 = vperm.xlu1 %1032, %v552_v54  }
  0x47   :  { %567 = vperm.xlu0 %1031, %v553_v60   ;;  %1044 = vperm.xlu1 %1032, %v1043_v56  }
  0x4b   :  { %572 = vperm.xlu0 %1031, %v554_v3   ;;  %1049 = vperm.xlu1 %1032, %v1048_v63  }
  0x4f   :  { %1054 = vperm.xlu0 %1031, %v1053_v4   ;;  %1059 = vperm.xlu1 %1032, %v1058_v5  }
  0x53   :  { %807 = vperm.xlu0 %1031, %v804_v6  }
  0x85   :  { %v106_v9 = vpop.permute.xlu1 %105 }
  0x86   :  { %v96_v8 = vpop.permute.xlu0 %95 }
  0x89   :  { %v111_v11 = vpop.permute.xlu1 %110 }
  0x8a   :  { %v101_v10 = vpop.permute.xlu0 %100 }
  0x8d   :  { %v121_v13 = vpop.permute.xlu1 %120 }
  0x8e   :  { %v116_v12 = vpop.permute.xlu0 %115 }
  0x91   :  { %v131_v18 = vpop.permute.xlu1 %130 }
  0x92   :  { %v126_v14 = vpop.permute.xlu0 %125 }
  0x95   :  { %v141_v30 = vpop.permute.xlu1 %140 }
  0x96   :  { %v136_v26 = vpop.permute.xlu0 %135 }
  0xa2   :  { %v146_v39 = vpop.permute.xlu0 %145  ;;  %v151_v43 = vpop.permute.xlu1 %150 }
  0xa6   :  { %v156_v51 = vpop.permute.xlu0 %155  ;;  %v161_v56 = vpop.permute.xlu1 %160 }
  0xaa   :  { %v166_v63 = vpop.permute.xlu0 %165  ;;  %v171_v4 = vpop.permute.xlu1 %170 }
  0xf8   :  { %v979_v15 = vpop.f32.mrb[0].mxu0 }
  0xf9   :  { %v312_v16 = vadd.f32 %v979_v15, %v106_v9  ;;  %v303_v17 = vpop.f32.mrb[1].mxu0 }
  0xfa   :  { %v304_v19 = vadd.f32 %v303_v17, %v96_v8  ;;  %v980_v20 = vpop.f32.mrb[2].mxu0  ;;  %v1081_v17 = vld [vmem:[%s1394_s5 + $0x10] sm:$0xff]  }
  0xfb   :  { %v315_v21 = vadd.f32 %v980_v20, %v111_v11  ;;  %v306_v22 = vpop.f32.mrb[3].mxu0  ;;  %v368_v24 = vmax.f32 %v312_v16, 0.0  ;;  %v1080_v16 = vld [vmem:[%s1394_s5 + $0x8] sm:$0xff]   ;;  %v409_v20 = vpop.permute.xlu0 %408 }
  0xfc   :  { %v307_v23 = vadd.f32 %v306_v22, %v101_v10  ;;  %v366_v27 = vmax.f32 %v304_v19, 0.0  ;;  %v1083_v19 = vld [vmem:[%s1396_s7] sm:$0xff]  }
  0xfd   :  { %v369_v25 = vmax.f32 %v315_v21, 0.0  ;;  %v414_v21 = vpop.permute.xlu1 %413 }
  0xfe   :  { %v367_v28 = vmax.f32 %v307_v23, 0.0 }
  0xff   :  { %v391_v29 = vpack.c.bf16 %v369_v25, %v368_v24  ;;  %v419_v22 = vpop.permute.xlu0 %418 }
 0x100   :  { %v983_v31 = vpop.f32.mrb[4].mxu0  ;;  %v390_v32 = vpack.c.bf16 %v367_v28, %v366_v27 }
 0x101   :  { %v328_v33 = vadd.f32 %v983_v31, %v126_v14  ;;  %v319_v34 = vpop.f32.mrb[5].mxu0  ;;  %v424_v23 = vpop.permute.xlu1 %423 }
 0x102   :  { %v320_v35 = vadd.f32 %v319_v34, %v116_v12  ;;  %v984_v36 = vpop.f32.mrb[6].mxu0  ;;  %993 = vmatprep.subr.bf16.mxu1 %v390_v32 }
 0x103   :  { %v331_v37 = vadd.f32 %v984_v36, %v131_v18  ;;  %v322_v38 = vpop.f32.mrb[7].mxu0  ;;  %994 = vmatpush3.bf16.msra.mxu1 %v390_v32  ;;  %v372_v41 = vmax.f32 %v328_v33, 0.0  ;;  %v1082_v18 = vld [vmem:[%s1394_s5 + $0x18] sm:$0xff]   ;;  %v429_v27 = vpop.permute.xlu0 %428 }
 0x104   :  { %v323_v40 = vadd.f32 %v322_v38, %v121_v13  ;;  %995 = vmatprep.subr.bf16.mxu1 %v391_v29  ;;  %v370_v44 = vmax.f32 %v320_v35, 0.0 }
 0x105   :  { %v373_v42 = vmax.f32 %v331_v37, 0.0  ;;  %v434_v32 = vpop.permute.xlu1 %433 }
 0x106   :  { %v371_v45 = vmax.f32 %v323_v40, 0.0 }
 0x107   :  { %v393_v46 = vpack.c.bf16 %v373_v42, %v372_v41  ;;  %996 = vmatpush3.bf16.msra.mxu1 %v391_v29 }
 0x108   :  { %v392_v47 = vpack.c.bf16 %v371_v45, %v370_v44  ;;  %v987_v48 = vpop.f32.mrb[8].mxu0 }
 0x109   :  { %v344_v49 = vadd.f32 %v987_v48, %v146_v39  ;;  %v335_v50 = vpop.f32.mrb[9].mxu0  ;;  %v439_v39 = vpop.permute.xlu0 %438 }
 0x10a   :  { %v336_v52 = vadd.f32 %v335_v50, %v136_v26  ;;  %v988_v53 = vpop.f32.mrb[10].mxu0  ;;  %997 = vmatprep.subr.bf16.mxu1 %v392_v47  ;;  %v444_v44 = vpop.permute.xlu1 %443 }
 0x10b   :  { %v347_v54 = vadd.f32 %v988_v53, %v151_v43  ;;  %v338_v55 = vpop.f32.mrb[11].mxu0  ;;  %998 = vmatpush3.bf16.msra.mxu1 %v392_v47  ;;  %v376_v58 = vmax.f32 %v344_v49, 0.0 }
 0x10c   :  { %v339_v57 = vadd.f32 %v338_v55, %v141_v30  ;;  %999 = vmatprep.subr.bf16.mxu1 %v393_v46  ;;  %v374_v60 = vmax.f32 %v336_v52, 0.0 }
 0x10d   :  { %v377_v59 = vmax.f32 %v347_v54, 0.0 }
 0x10e   :  { %v375_v61 = vmax.f32 %v339_v57, 0.0  ;;  %v862_v57 = vld [vmem:[%s1389_s0] sm:$0xff]  }
 0x10f   :  { %v395_v62 = vpack.c.bf16 %v377_v59, %v376_v58  ;;  %1000 = vmatpush3.bf16.msra.mxu1 %v393_v46  ;;  %v878_v58 = vld [vmem:[%s1390_s1] sm:$0xff]   ;;  %v1035_v59 = vpop.permute.xlu0 %1034 }
 0x110   :  { %v394_v0 = vpack.c.bf16 %v375_v61, %v374_v60  ;;  %v991_v1 = vpop.f32.mrb[12].mxu0  ;;  %v863_v60 = vunpack.c.l.bf16 %v862_v57  ;;  %v864_v61 = vunpack.c.h.bf16 %v862_v57 }
 0x111   :  { %v360_v2 = vadd.f32 %v991_v1, %v166_v63  ;;  %v351_v3 = vpop.f32.mrb[13].mxu0  ;;  %v880_v63 = vunpack.c.h.bf16 %v878_v58  ;;  %v920_v1 = vld [vmem:[%s1390_s1 + $0x8] sm:$0xff]  }
 0x112   :  { %v352_v5 = vadd.f32 %v351_v3, %v156_v51  ;;  %v992_v6 = vpop.f32.mrb[14].mxu0  ;;  %1001 = vmatprep.subr.bf16.mxu1 %v394_v0 }
 0x113   :  { %v363_v7 = vadd.f32 %v992_v6, %v171_v4  ;;  %v354_v8 = vpop.f32.mrb[15].mxu0  ;;  %1002 = vmatpush3.bf16.msra.mxu1 %v394_v0  ;;  %v380_v10 = vmax.f32 %v360_v2, 0.0  ;;  %v917_v0 = vld [vmem:[%s1389_s0 + $0x8] sm:$0xff]   ;;  %v1040_v2 = vpop.permute.xlu1 %1039  ;;  %v678_v4 = vmul.f32 %v880_v63, %v864_v61  ;;  %v1037_v6 = vunpack.i.h.bf16 %v1035_v59 }
 0x114   :  { %v355_v9 = vadd.f32 %v354_v8, %v161_v56  ;;  %1003 = vmatprep.subr.bf16.mxu1 %v395_v62  ;;  %v378_v12 = vmax.f32 %v352_v5, 0.0  ;;  %v1084_v56 = vld [vmem:[%s1396_s7 + $0x8] sm:$0xff]   ;;  %v558_v5 = vpop.permute.xlu0 %557  ;;  %v867_v8 = vunpack.c.l.bf16 %v917_v0 }
 0x115   :  { %v381_v11 = vmax.f32 %v363_v7, 0.0  ;;  %v1036_v7 = vunpack.i.l.bf16 %v1035_v59 }
 0x116   :  { %v379_v13 = vmax.f32 %v355_v9, 0.0  ;;  %v883_v9 = vunpack.c.l.bf16 %v920_v1 }
 0x117   :  { %v397_v14 = vpack.c.bf16 %v381_v11, %v380_v10  ;;  %1004 = vmatpush3.bf16.msra.mxu1 %v395_v62  ;;  %v879_v62 = vunpack.c.l.bf16 %v878_v58  ;;  %v868_v10 = vunpack.c.h.bf16 %v917_v0  ;;  %v884_v11 = vunpack.c.h.bf16 %v920_v1 }
 0x118   :  { %v396_v15 = vpack.c.bf16 %v379_v13, %v378_v12  ;;  %v563_v12 = vpop.permute.xlu1 %562  ;;  %v742_v13 = vmul.f32 %v1037_v6, %v678_v4 }
 0x119   :  { %v677_v3 = vmul.f32 %v879_v62, %v863_v60 }
 0x11a   :  { %1005 = vmatprep.subr.bf16.mxu1 %v396_v15 }
 0x11b   :  { %1006 = vmatpush3.bf16.msra.mxu1 %v396_v15  ;;  %v679_v15 = vmul.f32 %v883_v9, %v867_v8 }
 0x11c   :  { %1007 = vmatprep.subr.bf16.mxu1 %v397_v14 }
 0x11f   :  { %1008 = vmatpush3.bf16.msra.mxu1 %v397_v14  ;;  %v741_v14 = vmul.f32 %v1036_v7, %v677_v3 }
 0x122   :  { %1010 = vmatmul.mubr.bf16.vlgmr.msra.gmra.mrb[0].mxu1 %v1080_v16  ;;  %v1041_v16 = vunpack.i.l.bf16 %v1040_v2 }
 0x123   :  { %1013 = vmatprep.mubr.bf16.mxu1 %v1081_v17  ;;  %v918_v17 = vld [vmem:[%s1389_s0 + $0x10] sm:$0xff]  }
 0x12a   :  { %1014 = vmatmul.mubr.bf16.gmra.mrb[4].mxu1 %v1082_v18  ;;  %v568_v18 = vpop.permute.xlu0 %567 }
 0x12b   :  { %1025 = vmatprep.mubr.msk.bf16.mxu1 %vm585_vm0, %v1083_v19  ;;  %v921_v19 = vld [vmem:[%s1390_s1 + $0x10] sm:$0xff]  }
 0x1f5   :  { %v1011_v24 = vpop.f32.mrb[0].mxu1 }
 0x1f6   :  { %v513_v25 = vadd.f32 %v1011_v24, %v419_v22  ;;  %v504_v26 = vpop.f32.mrb[1].mxu1  ;;  %v749_v22 = vadd.f32 %v742_v13, %v741_v14  ;;  %v743_v24 = vmul.f32 %v1041_v16, %v679_v15 }
 0x1f7   :  { %v505_v28 = vadd.f32 %v504_v26, %v409_v20  ;;  %v1012_v29 = vpop.f32.mrb[2].mxu1  ;;  %v680_v20 = vmul.f32 %v884_v11, %v868_v10  ;;  %v1045_v26 = vpop.permute.xlu1 %1044 }
 0x1f8   :  { %v516_v30 = vadd.f32 %v1012_v29, %v424_v23  ;;  %v507_v31 = vpop.f32.mrb[3].mxu1  ;;  %v537_v34 = vmax.f32 %v513_v25, 0.0  ;;  %v1042_v23 = vunpack.i.h.bf16 %v1040_v2  ;;  %v887_v25 = vunpack.c.l.bf16 %v921_v19  ;;  %v573_v29 = vpop.permute.xlu0 %572 }
 0x1f9   :  { %v508_v33 = vadd.f32 %v507_v31, %v414_v21  ;;  %v535_v36 = vmax.f32 %v505_v28, 0.0  ;;  %v871_v21 = vunpack.c.l.bf16 %v918_v17  ;;  %v888_v28 = vunpack.c.h.bf16 %v921_v19 }
 0x1fa   :  { %v538_v35 = vmax.f32 %v516_v30, 0.0  ;;  %v744_v30 = vmul.f32 %v1042_v23, %v680_v20  ;;  %v750_v31 = vadd.f32 %v749_v22, %v743_v24 }
 0x1fb   :  { %v536_v37 = vmax.f32 %v508_v33, 0.0  ;;  %v1046_v33 = vunpack.i.l.bf16 %v1045_v26 }
 0x1fc   :  { %v548_v38 = vpack.c.bf16 %v538_v35, %v537_v34  ;;  %v919_v34 = vld [vmem:[%s1389_s0 + $0x18] sm:$0xff]   ;;  %s1114_s0 = smov [#allocation3]  }
 0x1fd   :  { %v547_v40 = vpack.c.bf16 %v536_v37, %v535_v36  ;;  %v1015_v41 = vpop.f32.mrb[4].mxu1  ;;  %v922_v35 = vld [vmem:[%s1390_s1 + $0x18] sm:$0xff]   ;;  %v1050_v36 = vpop.permute.xlu1 %1049  ;;  %v875_v37 = vunpack.c.l.bf16 %v919_v34  ;;  %s828_s1 = sshll.u32 %s1114_s0, 4  ;;  %s829_s1 = int_to_ptr.vmem [resolvable:$true] %s828_s1 }
 0x1fe   :  { %v529_v42 = vadd.f32 %v1015_v41, %v439_v39  ;;  %v520_v43 = vpop.f32.mrb[5].mxu1  ;;  %v751_v39 = vadd.f32 %v750_v31, %v744_v30  ;;  %v1047_v41 = vunpack.i.h.bf16 %v1045_v26  ;;  %v1052_v3 = vunpack.i.h.bf16 %v1050_v36  ;;  %s1089_s9 = scalar_lea.vmem %s829_s1, 16  ;;  %s1093_s10 = scalar_lea.vmem %s829_s1, 32 }
 0x1ff   :  { %v521_v45 = vadd.f32 %v520_v43, %v429_v27  ;;  %v1016_v46 = vpop.f32.mrb[6].mxu1  ;;  %1017 = vmatprep.subr.bf16.mxu1 %v547_v40  ;;  %v872_v27 = vunpack.c.h.bf16 %v918_v17  ;;  %v1055_v43 = vpop.permute.xlu0 %1054  ;;  %v1051_v4 = vunpack.i.l.bf16 %v1050_v36  ;;  %p1090_p0 = scmp.ne.s32.totalorder %s829_s1, %s1089_s9  ;;  %p1094_p1 = scmp.lt.s32.totalorder %s829_s1, %s829_s1 }
 0x200   :  { %v532_v47 = vadd.f32 %v1016_v46, %v444_v44  ;;  %v523_v48 = vpop.f32.mrb[7].mxu1  ;;  %1018 = vmatpush3.bf16.msra.mxu1 %v547_v40  ;;  %v541_v50 = vmax.f32 %v529_v42, 0.0  ;;  %v1057_v9 = vunpack.i.h.bf16 %v1055_v43  ;;  %p1095_p2 = scmp.lt.s32.totalorder %s1093_s10, %s1089_s9 }
 0x201   :  { %v524_v49 = vadd.f32 %v523_v48, %v434_v32  ;;  %1019 = vmatprep.subr.bf16.mxu1 %v548_v38  ;;  %v539_v52 = vmax.f32 %v521_v45, 0.0  ;;  %v681_v32 = vmul.f32 %v887_v25, %v871_v21  ;;  %v682_v40 = vmul.f32 %v888_v28, %v872_v27 }
 0x202   :  { %v542_v51 = vmax.f32 %v532_v47, 0.0  ;;  %v876_v45 = vunpack.c.h.bf16 %v919_v34  ;;  %v1056_v48 = vunpack.i.l.bf16 %v1055_v43  ;;  %v810_v21 = vlaneseq  ;;  %p1096_p3 = por %p1095_p2, %p1094_p1 }
 0x203   :  { %v540_v53 = vmax.f32 %v524_v49, 0.0  ;;  %v745_v42 = vmul.f32 %v1046_v33, %v681_v32  ;;  %v746_v46 = vmul.f32 %v1047_v41, %v682_v40  ;;  %v892_v49 = vunpack.c.h.bf16 %v922_v35  ;;  %v808_v30 = vpop.permute.xlu0 %807 }
 0x204   :  { %v550_v54 = vpack.c.bf16 %v542_v51, %v541_v50  ;;  %1020 = vmatpush3.bf16.msra.mxu1 %v548_v38  ;;  %v891_v38 = vunpack.c.l.bf16 %v922_v35  ;;  %v1060_v50 = vpop.permute.xlu1 %1059  ;;  %v811_v24 = vshrl.u32 %v810_v21, 7  ;;  %p1097_p4 = pnand %p1096_p3, %p1090_p0 }
 0x205   :  { %v549_v55 = vpack.c.bf16 %v540_v53, %v539_v52  ;;  %v752_v47 = vadd.f32 %v751_v39, %v745_v42  ;;  %v684_v53 = vmul.f32 %v892_v49, %v876_v45  ;;  %v1062_v14 = vunpack.i.h.bf16 %v1060_v50 }
 0x206   :  { %v683_v44 = vmul.f32 %v891_v38, %v875_v37  ;;  %v812_v28 = vsub.s32 0, %v811_v24 }
 0x207   :  { %1021 = vmatprep.subr.bf16.mxu1 %v549_v55  ;;  %v753_v51 = vadd.f32 %v752_v47, %v746_v46 }
 0x208   :  { %1022 = vmatpush3.bf16.msra.mxu1 %v549_v55  ;;  %v747_v52 = vmul.f32 %v1056_v48, %v683_v44  ;;  %v813_v33 = vrot.slane %v808_v30, %v812_v28 }
 0x209   :  { %1023 = vmatprep.subr.bf16.mxu1 %v550_v54 }
 0x20a   :  { %v754_v55 = vadd.f32 %v753_v51, %v747_v52 }
 0x20c   :  { %1024 = vmatpush3.bf16.msra.mxu1 %v550_v54  ;;  %v1061_v54 = vunpack.i.l.bf16 %v1060_v50 }
 0x20f   :  { %1026 = vmatmul.mubr.msk.bf16.vlgmr.msra.gmra.mrb[8].mxu1 %vm585_vm0, %v1084_v56  ;;  %v748_v56 = vmul.f32 %v1061_v54, %v684_v53 }
 0x211   :  { %v755_v59 = vadd.f32 %v754_v55, %v748_v56 }
 0x213   :  { %v756_v6 = vrot.slane %v755_v59, 4 }
 0x215   :  { %v757_v15 = vadd.f32 %v756_v6, %v755_v59 }
 0x217   :  { %v758_v19 = vrot.slane %v757_v15, 2 }
 0x2e2   :  { %v1027_v57 = vpop.f32.mrb[8].mxu1 }
 0x2e3   :  { %v626_v58 = vpop.f32.mrb[9].mxu1  ;;  %v635_v60 = vadd.f32 %v1027_v57, %v568_v18 }
 0x2e4   :  { %v627_v61 = vadd.f32 %v626_v58, %v558_v5  ;;  %v1028_v62 = vpop.f32.mrb[10].mxu1 }
 0x2e5   :  { %v629_v63 = vpop.f32.mrb[11].mxu1  ;;  %v638_v1 = vadd.f32 %v1028_v62, %v573_v29  ;;  %v643_v7 = vmax.f32 %v635_v60, 0.0 }
 0x2e6   :  { %v641_v0 = vmax.f32 %v627_v61, 0.0  ;;  %v630_v2 = vadd.f32 %v629_v63, %v563_v12  ;;  %v759_v12 = vadd.f32 %v758_v19, %v757_v15 }
 0x2e7   :  { %v644_v11 = vmax.f32 %v638_v1, 0.0  ;;  %v792_v16 = vmul.f32 %v1057_v9, %v643_v7 }
 0x2e8   :  { %v642_v8 = vmax.f32 %v630_v2, 0.0  ;;  %v790_v10 = vmul.f32 %v1051_v4, %v641_v0  ;;  %v760_v26 = vrot.slane %v759_v12, 1 }
 0x2e9   :  { %v793_v18 = vmul.f32 %v1062_v14, %v644_v11 }
 0x2ea   :  { %v791_v13 = vmul.f32 %v1052_v3, %v642_v8  ;;  %v761_v31 = vadd.f32 %v760_v26, %v759_v12 }
 0x2ec   :  { %v794_v17 = vadd.f32 %v791_v13, %v790_v10 }
 0x2ee   :  { %v795_v5 = vadd.f32 %v794_v17, %v792_v16 }
 0x2f0   :  { %v796_v20 = vadd.f32 %v795_v5, %v793_v18 }
 0x2f2   :  { %v797_v22 = vrot.slane %v796_v20, 4 }
 0x2f4   :  { %v798_v23 = vadd.f32 %v797_v22, %v796_v20 }
 0x2f6   :  { %v799_v25 = vrot.slane %v798_v23, 2 }
 0x2f8   :  { %v800_v27 = vadd.f32 %v799_v25, %v798_v23 }
 0x2fa   :  { %v801_v29 = vrot.slane %v800_v27, 1 }
 0x2fc   :  { %v802_v32 = vadd.f32 %v801_v29, %v800_v27 }
 0x2fe   :  { %v803_v34 = vadd.f32 %v802_v32, %v761_v31 }
 0x300   :  { %v814_v35 = vadd.f32 %v813_v33, %v803_v34 }
 0x302   :  { %v860_v36 = vmul.f32 -1.442695, %v814_v35 }
 0x304   :  { %1085 = vpow2.f32 %v860_v36 }
 0x30e   :  { %v1086_v37 = vpop.eup %1085 }
 0x30f   :  { %v818_v38 = vadd.f32 1.0, %v1086_v37 }
 0x311   :  { %1087 = vrcp.f32 %v818_v38 }
 0x31b   :  { %v1088_v39 = vpop.eup %1087 }
 0x31c   :  { %821 = vst [vmem:[#allocation3] sm:$0x1] %v1088_v39 }
 0x31d   :  { %1100 = shalt.err (!%p1097_p4)
}
 0x31e   :  { %s1101_s22 = scalar_lea.hbm %s1401_s12, 16 }
 0x31f   :  { %p1102_p5 = scmp.ne.s32.totalorder %s1401_s12, %s1101_s22  ;;  %p1105_p6 = scmp.lt.u32.totalorder %s1101_s22, %s1401_s12 }
 0x321   :  { %p1107_p7 = pnand %p1105_p6, %p1102_p5 }
 0x323   :  { %1110 = shalt.err (!%p1107_p7)
}
 0x324   :  { %831 = dma.vmem_to_hbm [thread:$0]  %s829_s1, 16, %s1401_s12, [#allocation4]  }
 0x325   :  { %1111 = dma.done.wait [#allocation4], 16  }
 0x326   :  { %1112 = vsyncadd [#allocation4], 4294967280 }
 0x327   :  { %835 = vsyncpa [#allocation4], 1 }

</bundles_post_ra>
